<compile_context>
chip_gen: v7x
topology: tpu7x:2x2x1
jax: 0.10.0
libtpu: 0.0.40
codegen_flags: <defaults>
</compile_context>

<pallas_src>
import functools

import jax
import jax.numpy as jnp
from jax.experimental import pallas as pl
from jax.experimental.pallas import tpu as pltpu


def _se_kernel(x_ref, w1t_ref, b1_ref, w2t_ref, b2_ref, o_ref, *, inv_hw):
    # x_ref: (Nb, C, HWp); padded spatial lanes are zero.

    # Squeeze: global average pool (f32 accumulation, divide by true HW).
    pooled = jnp.sum(x_ref[...].astype(jnp.float32), axis=-1) * inv_hw   # (Nb, C)

    # Excite: two 1x1 convs == two small matmuls, batched over Nb.
    h = jnp.dot(pooled, w1t_ref[...], preferred_element_type=jnp.float32)
    h = jnp.maximum(h + b1_ref[...], 0.0)                                # (Nb, mid)
    s = jnp.dot(h, w2t_ref[...], preferred_element_type=jnp.float32)
    s = jax.nn.sigmoid(s + b2_ref[...])                                  # (Nb, C)

    # Gate: re-read x_ref in its native dtype (don't reuse an upcast copy).
    gate = s.astype(x_ref.dtype)[:, :, None]                             # (Nb, C, 1)
    o_ref[...] = (x_ref[...] * gate).astype(o_ref.dtype)


def _pick_batch_block(n, per_batch_bytes, target_bytes=2 << 20):
    """Largest divisor of n whose block fits the byte budget; keep >= 2 grid
    steps when n >= 2 so both v7x TensorCores get work."""
    nb_max = max(1, target_bytes // max(per_batch_bytes, 1))
    nb = 1
    for d in range(1, n + 1):
        if n % d == 0 and d <= nb_max:
            nb = d
    if n >= 2 and n // nb < 2:
        for d in range(n // 2, 0, -1):
            if n % d == 0:
                nb = d
                break
    return nb


def se_layer_ka(x_nchw, w1, b1, w2, b2):
    """SELayer_KA forward.

    x_nchw: (N, C, H, W)
    w1: (mid, C), b1: (mid,)   -- Conv2d(C, mid, k=1) weight[:, :, 0, 0] / bias
    w2: (C, mid), b2: (C,)     -- Conv2d(mid, C, k=1) weight[:, :, 0, 0] / bias
    """
    N, C, H, W = x_nchw.shape
    mid = w1.shape[0]
    HW = H * W
    HWp = ((HW + 127) // 128) * 128            # lane-dense spatial axis

    x_flat = x_nchw.reshape(N, C, HW)
    if HWp != HW:
        # Zero padding: contributes 0 to the pooled sum; sliced off afterwards.
        x_flat = jnp.pad(x_flat, ((0, 0), (0, 0), (0, HWp - HW)))

    itemsize = jnp.dtype(x_flat.dtype).itemsize
    nb = _pick_batch_block(N, C * HWp * itemsize)

    # Lay weights out so the kernel matmuls are (Nb,C)@(C,mid), (Nb,mid)@(mid,C).
    w1_t = w1.T.astype(jnp.float32)            # (C, mid)
    w2_t = w2.T.astype(jnp.float32)            # (mid, C)
    b1_r = b1.reshape(1, mid).astype(jnp.float32)
    b2_r = b2.reshape(1, C).astype(jnp.float32)

    block_bytes = nb * C * HWp * itemsize
    weight_bytes = 4 * (w1_t.size + w2_t.size + b1_r.size + b2_r.size)
    # Double-buffered input + output blocks + weights + headroom.
    vmem_limit = int(min(max(4 * block_bytes + 2 * weight_bytes + (4 << 20),
                             16 << 20), 128 << 20))

    kernel = functools.partial(_se_kernel, inv_hw=1.0 / HW)

    out_flat = pl.pallas_call(
        kernel,
        out_shape=jax.ShapeDtypeStruct((N, C, HWp), x_nchw.dtype),
        grid_spec=pltpu.PrefetchScalarGridSpec(
            num_scalar_prefetch=0,
            grid=(N // nb,),
            in_specs=[
                pl.BlockSpec((nb, C, HWp), lambda b: (b, 0, 0)),   # x block
                pl.BlockSpec((C, mid), lambda b: (0, 0)),          # w1.T
                pl.BlockSpec((1, mid), lambda b: (0, 0)),          # b1
                pl.BlockSpec((mid, C), lambda b: (0, 0)),          # w2.T
                pl.BlockSpec((1, C), lambda b: (0, 0)),            # b2
            ],
            out_specs=pl.BlockSpec((nb, C, HWp), lambda b: (b, 0, 0)),
        ),
        compiler_params=pltpu.CompilerParams(
            dimension_semantics=("parallel",),
            vmem_limit_bytes=vmem_limit),
    )(x_flat, w1_t, b1_r, w2_t, b2_r)

    if HWp != HW:
        out_flat = out_flat[:, :, :HW]
    return out_flat.reshape(N, C, H, W)


def _reference(x_nchw, w1, b1, w2, b2):
    # Pure-JAX reference mirroring the PyTorch module.
    pooled = jnp.mean(x_nchw, axis=(2, 3))                     # (N, C)
    h = jnp.maximum(pooled @ w1.T + b1, 0.0)                   # (N, mid)
    s = jax.nn.sigmoid(h @ w2.T + b2)                          # (N, C)
    return x_nchw * s[:, :, None, None]


if __name__ == "__main__":
    key = jax.random.PRNGKey(0)
    N, C, H, W = 2, 4, 16, 16
    # channel < 64 -> mid == channel (per the PyTorch __init__)
    mid = C // 16 if C >= 64 else C

    kx, k1, kb1, k2, kb2 = jax.random.split(key, 5)
    x = jax.random.normal(kx, (N, C, H, W), dtype=jnp.float32)

    # Deterministic synthetic parameters (Conv2d kernel_size=1 weights/biases).
    w1 = jax.random.normal(k1, (mid, C), dtype=jnp.float32) * 0.1   # (out=mid, in=C)
    b1 = jax.random.normal(kb1, (mid,), dtype=jnp.float32) * 0.1
    w2 = jax.random.normal(k2, (C, mid), dtype=jnp.float32) * 0.1   # (out=C, in=mid)
    b2 = jax.random.normal(kb2, (C,), dtype=jnp.float32) * 0.1

    out = se_layer_ka(x, w1, b1, w2, b2)
    out = jax.block_until_ready(out)

    ref = _reference(x, w1, b1, w2, b2)
    assert out.shape == (N, C, H, W)
    assert jnp.allclose(out, ref, atol=1e-5, rtol=1e-5), "mismatch vs reference"

    print("KERNEL_OK")
</pallas_src>

<mosaic_0001>
module attributes {stable_mosaic.version = 11 : i64} {
  func.func @_se_kernel(%arg0: i32, %arg1: memref<1x4x256xf32, #tpu.memory_space<vmem>>, %arg2: memref<4x4xf32, #tpu.memory_space<vmem>>, %arg3: memref<1x4xf32, #tpu.memory_space<vmem>>, %arg4: memref<4x4xf32, #tpu.memory_space<vmem>>, %arg5: memref<1x4xf32, #tpu.memory_space<vmem>>, %arg6: memref<1x4x256xf32, #tpu.memory_space<vmem>>) attributes {dimension_semantics = [#tpu.dimension_semantics<parallel>], iteration_bounds = array<i64: 2>, scalar_prefetch = 0 : i64, scratch_operands = 0 : i64, tpu.core_type = #tpu.core_type<tc>, window_params = [{transform_indices = @transform_0, window_bounds = array<i64: 1, 4, 256>}, {pipeline_mode = #tpu.pipeline_mode<synchronous>, transform_indices = @transform_1, window_bounds = array<i64: 4, 4>}, {pipeline_mode = #tpu.pipeline_mode<synchronous>, transform_indices = @transform_2, window_bounds = array<i64: 1, 4>}, {pipeline_mode = #tpu.pipeline_mode<synchronous>, transform_indices = @transform_3, window_bounds = array<i64: 4, 4>}, {pipeline_mode = #tpu.pipeline_mode<synchronous>, transform_indices = @transform_4, window_bounds = array<i64: 1, 4>}, {transform_indices = @transform_5, window_bounds = array<i64: 1, 4, 256>}]} {
    %c0 = arith.constant 0 : index
    %c0_0 = arith.constant 0 : index
    %c0_1 = arith.constant 0 : index
    %0 = vector.load %arg1[%c0, %c0_0, %c0_1] : memref<1x4x256xf32, #tpu.memory_space<vmem>>, vector<1x4x256xf32>
    %cst = arith.constant dense<0.000000e+00> : vector<1x4xf32>
    %1 = vector.multi_reduction <add>, %0, %cst [2] : vector<1x4x256xf32> to vector<1x4xf32>
    %cst_2 = arith.constant 3.906250e-03 : f32
    %2 = vector.broadcast %cst_2 : f32 to vector<1x4xf32>
    %3 = arith.mulf %1, %2 : vector<1x4xf32>
    %c0_3 = arith.constant 0 : index
    %c0_4 = arith.constant 0 : index
    %4 = vector.load %arg2[%c0_3, %c0_4] : memref<4x4xf32, #tpu.memory_space<vmem>>, vector<4x4xf32>
    %cst_5 = arith.constant dense<0.000000e+00> : vector<1x4xf32>
    %5 = tpu.matmul %3, %4, %cst_5 {dimension_numbers = #tpu.dot_dimension_numbers<[1], [0], [0], [1], [0, 0, 1, 1], [], []>} : vector<1x4xf32>, vector<4x4xf32>, vector<1x4xf32> -> vector<1x4xf32>
    %c0_6 = arith.constant 0 : index
    %c0_7 = arith.constant 0 : index
    %6 = vector.load %arg3[%c0_6, %c0_7] : memref<1x4xf32, #tpu.memory_space<vmem>>, vector<1x4xf32>
    %7 = arith.addf %5, %6 : vector<1x4xf32>
    %cst_8 = arith.constant 0.000000e+00 : f32
    %8 = vector.broadcast %cst_8 : f32 to vector<1x4xf32>
    %9 = arith.maximumf %7, %8 : vector<1x4xf32>
    %c0_9 = arith.constant 0 : index
    %c0_10 = arith.constant 0 : index
    %10 = vector.load %arg4[%c0_9, %c0_10] : memref<4x4xf32, #tpu.memory_space<vmem>>, vector<4x4xf32>
    %cst_11 = arith.constant dense<0.000000e+00> : vector<1x4xf32>
    %11 = tpu.matmul %9, %10, %cst_11 {dimension_numbers = #tpu.dot_dimension_numbers<[1], [0], [0], [1], [0, 0, 1, 1], [], []>} : vector<1x4xf32>, vector<4x4xf32>, vector<1x4xf32> -> vector<1x4xf32>
    %c0_12 = arith.constant 0 : index
    %c0_13 = arith.constant 0 : index
    %12 = vector.load %arg5[%c0_12, %c0_13] : memref<1x4xf32, #tpu.memory_space<vmem>>, vector<1x4xf32>
    %13 = arith.addf %11, %12 : vector<1x4xf32>
    %14 = arith.negf %13 : vector<1x4xf32>
    %15 = math.exp %14 : vector<1x4xf32>
    %cst_14 = arith.constant 1.000000e+00 : f32
    %16 = vector.broadcast %cst_14 : f32 to vector<1x4xf32>
    %17 = arith.addf %16, %15 : vector<1x4xf32>
    %18 = arith.divf %16, %17 : vector<1x4xf32>
    %19 = vector.shape_cast %18 : vector<1x4xf32> to vector<1x4x1xf32>
    %c0_15 = arith.constant 0 : index
    %c0_16 = arith.constant 0 : index
    %c0_17 = arith.constant 0 : index
    %20 = vector.load %arg1[%c0_15, %c0_16, %c0_17] : memref<1x4x256xf32, #tpu.memory_space<vmem>>, vector<1x4x256xf32>
    %21 = vector.broadcast %19 : vector<1x4x1xf32> to vector<1x4x256xf32>
    %22 = arith.mulf %20, %21 : vector<1x4x256xf32>
    %c0_18 = arith.constant 0 : index
    %c0_19 = arith.constant 0 : index
    %c0_20 = arith.constant 0 : index
    %23 = vector.load %arg6[%c0_18, %c0_19, %c0_20] : memref<1x4x256xf32, #tpu.memory_space<vmem>>, vector<1x4x256xf32>
    tpu.vector_store %arg6[%c0_18, %c0_19, %c0_20], %22 {strides = array<i32>} : memref<1x4x256xf32, #tpu.memory_space<vmem>>, vector<1x4x256xf32>,
    return
  }
  func.func @transform_0(%arg0: i32) -> (i32, i32, i32) {
    %c0_i32 = arith.constant 0 : i32
    %c0_i32_0 = arith.constant 0 : i32
    %c0_i32_1 = arith.constant 0 : i32
    return %arg0, %c0_i32, %c0_i32_0 : i32, i32, i32
  }
  func.func @transform_1(%arg0: i32) -> (i32, i32) {
    %c0_i32 = arith.constant 0 : i32
    %c0_i32_0 = arith.constant 0 : i32
    %c0_i32_1 = arith.constant 0 : i32
    return %c0_i32, %c0_i32_0 : i32, i32
  }
  func.func @transform_2(%arg0: i32) -> (i32, i32) {
    %c0_i32 = arith.constant 0 : i32
    %c0_i32_0 = arith.constant 0 : i32
    %c0_i32_1 = arith.constant 0 : i32
    return %c0_i32, %c0_i32_0 : i32, i32
  }
  func.func @transform_3(%arg0: i32) -> (i32, i32) {
    %c0_i32 = arith.constant 0 : i32
    %c0_i32_0 = arith.constant 0 : i32
    %c0_i32_1 = arith.constant 0 : i32
    return %c0_i32, %c0_i32_0 : i32, i32
  }
  func.func @transform_4(%arg0: i32) -> (i32, i32) {
    %c0_i32 = arith.constant 0 : i32
    %c0_i32_0 = arith.constant 0 : i32
    %c0_i32_1 = arith.constant 0 : i32
    return %c0_i32, %c0_i32_0 : i32, i32
  }
  func.func @transform_5(%arg0: i32) -> (i32, i32, i32) {
    %c0_i32 = arith.constant 0 : i32
    %c0_i32_0 = arith.constant 0 : i32
    %c0_i32_1 = arith.constant 0 : i32
    return %arg0, %c0_i32, %c0_i32_0 : i32, i32, i32
  }
}

</mosaic_0001>

<bundles_post_ra>
// kernel: tpu_custom_call.1
= control target key start
LH: loop header
LB: loop body
LE: loop exit
PB: predicated region body
PF: predicated region fallthrough
CT: control target
= control target key end

     0   :  { %10 = vsyncpa [#allocation3], 0  ;;  %s1034_s0 = inlined_call_operand.hbm [shape: f32[2,4,256], index: 0, kind: input, shape index: {}]   ;;  %s1035_s1 = inlined_call_operand.hbm [shape: f32[4,4], index: 1, kind: input, shape index: {}]   ;;  %s1036_s2 = inlined_call_operand.vmem [shape: f32[1,4], index: 2, kind: input, shape index: {}]   ;;  %s1037_s3 = inlined_call_operand.vmem [shape: f32[4,4], index: 3, kind: input, shape index: {}]   ;;  %s1038_s4 = inlined_call_operand.vmem [shape: f32[1,4], index: 4, kind: input, shape index: {}]   ;;  %s1039_s5 = inlined_call_operand.hbm [shape: f32[2,4,256], index: 5, kind: output, shape index: {}]  }
   0x1   :  { %12 = vsyncpa [#allocation3 + $0x1], 0 }
   0x2   :  { %13 = vsyncpa [#allocation6], 0 }
   0x3   :  { %14 = vsyncpa [#allocation4], 0 }
   0x4   :  { %16 = vsyncpa [#allocation4 + $0x1], 0  ;;  %s816_s18 = smov 0   ;;  %s818_s19 = smov 0  }
   0x5   :  { %s820_s20 = smov 0   ;;  %s822_s21 = smov 0  }
   0x6 LB: > { %s837_s22 = sadd.s32 4294967295, %s778_s21   ;;  %s548_s23 = sadd.s32 4294967294, %s778_s21   ;;  %s778_s21 = sphi %s822_s21, %s1063_s21   ;;  %s774_s20 = sphi %s820_s20, %s1062_s20   ;;  %s770_s19 = sphi %s818_s19, %s1061_s19   ;;  %s766_s18 = sphi %s816_s18, %s1060_s18  }
   0x7   : > { %p42_p0 = scmp.ne.s32.totalorder %s770_s19, %s766_s18  ;;  %p1040_p1 = scmp.eq.s32.totalorder %s837_s22, 0 }
   0x8   : > { %p156_p3 = scmp.eq.s32.totalorder %s548_s23, 1  ;;  %p549_p5 = scmp.ge.s32.totalorder %s778_s21, 1 }
   0x9   : > { %p846_p4 = por %p1040_p1, %p42_p0  ;;  %p163_p7 = scmp.lt.s32.totalorder %s778_s21, 3 }
   0xa   : > { %p851_p6 = por %p156_p3, %p42_p0  ;;  %s780_s27 = smov [#allocation5]  }
   0xb   : > { %s1043_s24 = scalar_select %p846_p4, 1, 0 }
   0xc   : > { %s1044_s25 = scalar_select %p851_p6, 1, 0 }
   0xd   : > { %p856_p8 = pnand %p549_p5, %p163_p7  ;;  %s176_s28 = sshll.u32 %s780_s27, 4  ;;  %s177_s28 = int_to_ptr.vmem [resolvable:$true] %s176_s28 }
   0xe   : > { %s864_s29 = sadd.s32 1, %s778_s21   ;;  %s29_s8 = sadd.s32 1, %s774_s20 }
   0xf   : > { %s1045_s26 = scalar_select %p856_p8, 1, 0 }
  0x10   : > { %p593_p10 = pneg %p856_p8  ;;  %s26_s6 = ssub.s32 %s778_s21, %s864_s29 }
  0x11   : > { %p874_p12 = scmp.eq.s32.totalorder %s26_s6, 0  ;;  %s650_s11 = scalar_lea.hbm %s1035_s1, 64 }
  0x12   : > { %p868_p11 = pnand %p593_p10, %p1040_p1  ;;  %p651_p0 = scmp.ne.s32.totalorder %s1035_s1, %s650_s11 }
  0x13   : > { %s1047_s7 = scalar_select %p874_p12, 1, 0 }
  0x14   : > { %p652_p3 = pneg %p868_p11  ;;  %p657_p10 = scmp.lt.u32.totalorder %s650_s11, %s1035_s1 }
  0x16   : > { %p653_p5 = pnand %p652_p3, %p651_p0 }
  0x18   : > { %p654_p7 = pneg %p653_p5 }
  0x1a   : > { %p659_p9 = pnand %p657_p10, %p654_p7 }
  0x1c   : > { %662 = shalt.err (!%p659_p9)
}
  0x1d   : > { %s663_s16 = scalar_lea.vmem %s177_s28, 64  ;;  %p671_p6 = scmp.lt.s32.totalorder %s177_s28, %s177_s28 }
  0x1e   : > { %p664_p1 = scmp.ne.s32.totalorder %s177_s28, %s663_s16  ;;  %p672_p4 = scmp.lt.s32.totalorder %s663_s16, %s663_s16 }
  0x20   : > { %p666_p2 = pnand %p664_p1, %p652_p3  ;;  %p673_p8 = por %p672_p4, %p671_p6 }
  0x22   : > { %p667_p13 = pneg %p666_p2 }
  0x24   : > { %p674_p12 = pnand %p673_p8, %p667_p13 }
  0x26   : > { %677 = shalt.err (!%p674_p12)
}
  0x27   : > { %596 = dma.hbm_to_vmem [thread:$0]  (!%p868_p11), %s1035_s1, 64, %s177_s28, [#allocation6]  }
  0x28   : > { %p1048_p1 = scmp.ne.s32.totalorder %s1047_s7, 0  ;;  %p37_p2 = scmp.eq.s32.totalorder %s778_s21, 0 }
  0x29   : > { %p1049_p4 = scmp.ne.s32.totalorder %s774_s20, %s770_s19  ;;  %p1050_p6 = scmp.eq.s32.totalorder %s837_s22, 1 }
  0x2a   : > { %s900_s27 = scalar_select %p1048_p1, %s774_s20, %s29_s8  }
  0x2b   : > { %p908_p8 = por %p1050_p6, %p1049_p4  ;;  %p606_p9 = scmp.lt.s32.totalorder %s778_s21, 2 }
  0x2c   : > { %s196_s6 = sand.u32 1, %s774_s20   ;;  %p1052_p12 = pmov %p1049_p4 }
  0x2d   : > { %s552_s9 = sshll.u32 %s196_s6, 3  ;;  %s569_s10 = sshll.u32 %s778_s21, 7 }
  0x2e   : > { %p38_p13 = por %p37_p2, %p1052_p12  ;;  %s921_s28 = scalar_lea.hbm %s1034_s0, %s569_s10 }
  0x2f   : > { %s200_s7 = scalar_lea.vmem [#allocation2], %s552_s9  ;;  %s197_s14 = scalar_lea.sflag [#allocation3], %s196_s6 }
  0x30   : > { %s208_s8 = sshll.u32 %s200_s7, 4  ;;  %p923_p11 = pnand %p606_p9, %p38_p13  ;;  %s927_s8 = int_to_ptr.vmem [resolvable:$true] %s208_s8 }
  0x31   : > { %s678_s15 = scalar_lea.hbm %s921_s28, 128  ;;  %s683_s23 = scalar_lea.hbm %s1034_s0, 256 }
  0x32   : > { %p679_p0 = scmp.ne.s32.totalorder %s921_s28, %s678_s15  ;;  %p680_p3 = pneg %p923_p11 }
  0x33   : > { %p684_p10 = scmp.lt.u32.totalorder %s921_s28, %s1034_s0  ;;  %p685_p1 = scmp.lt.u32.totalorder %s683_s23, %s678_s15 }
  0x34   : > { %p681_p5 = pnand %p680_p3, %p679_p0  ;;  %p687_p4 = scmp.lt.u32.totalorder %s678_s15, %s921_s28 }
  0x35   : > { %p686_p2 = por %p685_p1, %p684_p10 }
  0x36   : > { %p682_p7 = pneg %p681_p5 }
  0x37   : > { %p688_p6 = por %p687_p4, %p686_p2 }
  0x39   : > { %p689_p9 = pnand %p688_p6, %p682_p7 }
  0x3b   : > { %692 = shalt.err (!%p689_p9)
}
  0x3c   : > { %s693_s6 = scalar_lea.vmem %s927_s8, 128  ;;  %s781_s11 = smov [#allocation2]  }
  0x3d   : > { %p694_p12 = scmp.ne.s32.totalorder %s927_s8, %s693_s6  ;;  %s698_s12 = sshll.u32 %s781_s11, 4  ;;  %s699_s12 = int_to_ptr.vmem [resolvable:$false] %s698_s12 }
  0x3e   : > { %s700_s7 = scalar_lea.vmem %s699_s12, 256  ;;  %p701_p5 = scmp.lt.s32.totalorder %s927_s8, %s699_s12 }
  0x3f   : > { %p696_p13 = pnand %p694_p12, %p680_p3  ;;  %p702_p10 = scmp.lt.s32.totalorder %s700_s7, %s693_s6 }
  0x41   : > { %p697_p0 = pneg %p696_p13  ;;  %p703_p1 = por %p702_p10, %p701_p5 }
  0x43   : > { %p704_p2 = pnand %p703_p1, %p697_p0 }
  0x45   : > { %707 = shalt.err (!%p704_p2)
}
  0x46   : > { %600 = dma.hbm_to_vmem [thread:$0]  (!%p923_p11), %s921_s28, 128, %s927_s8, %s197_s14  }
  0x47   : > { %p1054_p7 = scmp.ne.s32.totalorder %s1045_s26, 0 }
  0x48   : > { %s957_s15 = sand.u32 (!%p1054_p7), 1, %s770_s19   ;;  %p1055_p3 = scmp.ne.s32.totalorder (!%p1054_p7), %s1043_s24, 0 }
  0x49   : > { %217 = sbr.rel (%p1054_p7) target bundleno = 827 (0x33b), region = 40  ;;  %s556_s16 = sshll.u32 (!%p1054_p7), %s957_s15, 3 }
  0x4a   : > { %s220_s17 = scalar_lea.sflag (!%p1054_p7), [#allocation3], %s957_s15  ;;  %s223_s23 = scalar_lea.vmem (!%p1054_p7), [#allocation2], %s556_s16 }
  0x50   : > { %753 = dma.done.wait (%p1055_p3), %s220_s17, 128  }
  0x51   : > { %755 = vsyncadd (%p1055_p3), %s220_s17, 4294967168  ;;  %p1056_p11 = scmp.eq.s32.totalorder %s837_s22, 0 }
  0x53   : > { %757 = dma.done.wait (%p1056_p11), [#allocation6], 64   ;;  %p1057_p4 = pmov %p1056_p11 }
  0x54   : > { %vm258_vm0 = vcmask 1043456   ;;  %v254_v0 = vld [vmem:[%s223_s23] sm:$0xff]  ;;  %v782_v5 = vmov 0.0   ;;  %v265_v6 = vld [vmem:[#allocation5] sm:$0xf]  ;;  %vm783_vm1 = vmmov 0   ;;  %v268_v7 = vlaneseq }
  0x55   : > { %759 = vsyncadd (%p1057_p4), [#allocation6], 4294967232  ;;  %v256_v1 = vcombine.high %v254_v0, %v254_v0  ;;  %v259_v2 = vsel %vm258_vm0, %v254_v0, 0.0  ;;  %575 = vmatprep.subr.mxu0 %v782_v5  ;;  %580 = vmatprep.subr.mxu1 %v782_v5  ;;  %vm274_vm2 = vcmask 31744   ;;  %v351_v14 = vld [vmem:[%s1037_s3] sm:$0xf] }
  0x56   : > { %576 = vmatpush3.msk.msra.mxu0 %vm258_vm0, %v265_v6  ;;  %577 = vmatprep.mubr.msk.f32.mxu0 %vm783_vm1, %v782_v5  ;;  %v269_v8 = vand.u32 127, %v268_v7  ;;  %v271_v9 = vshrl.u32 %v268_v7, 7  ;;  %v266_v15 = vld [vmem:[%s1036_s2] sm:$0x1]  ;;  %v784_v30 = vmov 839922192  }
  0x57   : > { %v260_v3 = vsel %vm258_vm0, %v256_v1, 0.0  ;;  %582 = vmatprep.mubr.msk.f32.mxu1 %vm783_vm1, %v782_v5  ;;  %581 = vmatpush3.msk.msra.mxu1 %vm258_vm0, %v351_v14  ;;  %v352_v20 = vld [vmem:[%s1038_s4] sm:$0x1]  ;;  %v444_v31 = vunpack.c.l.s4 %v784_v30  ;;  %s570_s9 = sshll.u32 %s837_s22, 7  ;;  %s253_s10 = scalar_lea.vmem [#allocation7], %s556_s16 }
  0x58   : > { %v261_v4 = vadd.f32 %v260_v3, %v259_v2  ;;  %v272_v10 = vsub.s32 %v269_v8, %v271_v9  ;;  %v437_v27 = vsub.s32 0, %v271_v9  ;;  %s468_s6 = sshll.u32 %s253_s10, 4  ;;  %s990_s7 = scalar_lea.hbm %s1039_s5, %s570_s9  ;;  %s992_s6 = int_to_ptr.vmem [resolvable:$true] %s468_s6 }
  0x59   : > { %v445_v32 = vunpack.c.0.s8 %v444_v31  ;;  %s454_s17 = scalar_lea.sflag [#allocation4], %s957_s15  ;;  %s708_s23 = scalar_lea.vmem %s992_s6, 128 }
  0x5a   : > { %262 = vadd.xlane.f32.xlu0 %v261_v4  ;;  %p709_p6 = scmp.ne.s32.totalorder %s992_s6, %s708_s23  ;;  %s785_s22 = smov [#allocation7]  }
  0x5b   : > { %v448_v33 = vsub.s32 %v445_v32, %v271_v9  ;;  %s712_s16 = sshll.u32 %s785_s22, 4  ;;  %s713_s16 = int_to_ptr.vmem [resolvable:$false] %s712_s16 }
  0x5c   : > { %p710_p9 = pnand %p709_p6, %p908_p8  ;;  %s714_s24 = scalar_lea.vmem %s713_s16, 256 }
  0x5d   : > { %p715_p13 = scmp.lt.s32.totalorder %s992_s6, %s713_s16  ;;  %p716_p0 = scmp.lt.s32.totalorder %s714_s24, %s708_s23 }
  0x5e   : > { %p711_p12 = pneg %p710_p9 }
  0x5f   : > { %p717_p5 = por %p716_p0, %p715_p13 }
  0x61   : > { %p718_p10 = pnand %p717_p5, %p711_p12 }
  0xe7   : > { %v263_v11 = vpop.xlane.xlu0 %262 }
  0xe8   : > { %v264_v12 = vmul.f32 0.00390625, %v263_v11 }
  0xea   : > { %v273_v13 = vrot.slane %v264_v12, %v272_v10 }
  0xec   : > { %578 = vmatmul.mubr.msk.f32.vlgmr.msra.gmra.mrb[0].mxu0 %vm274_vm2, %v273_v13 }
 0x1bf   : > { %v346_v16 = vpop.f32.mrb[0].mxu0 }
 0x1c0   : > { %v347_v17 = vadd.f32 %v346_v16, %v266_v15  ;;  %v579_v18 = vpop.f32.mrb[1].mxu0 }
 0x1c2   : > { %v350_v19 = vmax.f32 %v347_v17, 0.0 }
 0x1c4   : > { %583 = vmatmul.mubr.msk.f32.vlgmr.msra.gmra.mrb[0].mxu1 %vm274_vm2, %v350_v19 }
 0x297   : > { %v425_v21 = vpop.f32.mrb[0].mxu1 }
 0x298   : > { %v426_v22 = vadd.f32 %v425_v21, %v352_v20  ;;  %v584_v23 = vpop.f32.mrb[1].mxu1 }
 0x29a   : > { %v563_v24 = vmul.f32 -1.442695, %v426_v22 }
 0x29c   : > { %646 = vpow2.f32 %v563_v24 }
 0x2a6   : > { %v647_v25 = vpop.eup %646 }
 0x2a7   : > { %v432_v26 = vadd.f32 1.0, %v647_v25 }
 0x2a9   : > { %648 = vrcp.f32 %v432_v26 }
 0x2b3   : > { %v649_v28 = vpop.eup %648 }
 0x2b4   : > { %v438_v29 = vrot.slane %v649_v28, %v437_v27 }
 0x2b6   : > { %440 = vbcast.lane.b32.xlu0 %v438_v29, 256 }
 0x328   : > { %v441_v34 = vpop.permute.xlu0 %440 }
 0x329   : > { %v449_v35 = vrot.slane %v441_v34, %v448_v33 }
 0x32b   : > { %v451_v36 = vmul.f32 %v449_v35, %v254_v0 }
 0x32d   : > { %452 = vst [vmem:[%s253_s10] sm:$0xff] %v451_v36 }
 0x32e   : > { %721 = shalt.err (!%p718_p10)
}
 0x32f   : > { %s722_s15 = scalar_lea.hbm %s990_s7, 128  ;;  %s726_s8 = scalar_lea.hbm %s1039_s5, 256 }
 0x330   : > { %p723_p1 = scmp.ne.s32.totalorder %s990_s7, %s722_s15  ;;  %p727_p3 = scmp.lt.u32.totalorder %s990_s7, %s1039_s5 }
 0x331   : > { %p728_p11 = scmp.lt.u32.totalorder %s726_s8, %s722_s15  ;;  %p730_p6 = scmp.lt.u32.totalorder %s722_s15, %s990_s7 }
 0x332   : > { %p724_p2 = pnand %p723_p1, %p908_p8 }
 0x333   : > { %p729_p4 = por %p728_p11, %p727_p3 }
 0x334   : > { %p725_p7 = pneg %p724_p2 }
 0x335   : > { %p731_p9 = por %p730_p6, %p729_p4 }
 0x337   : > { %p732_p12 = pnand %p731_p9, %p725_p7 }
 0x339   : > { %735 = shalt.err (!%p732_p12)
}
 0x33a   : > { %591 = dma.vmem_to_hbm [thread:$0]  (%p908_p8), %s992_s6, 128, %s990_s7, %s454_s17  }
 0x33b PF: > { %s480_s9 = sand.u32 1, %s766_s18   ;;  %p1058_p13 = scmp.ne.s32.totalorder %s1044_s25, 0 }
 0x33c   : > { %p1059_p0 = scmp.ge.s32.totalorder %s778_s21, 2  ;;  %s481_s10 = scalar_lea.sflag [#allocation4], %s480_s9 }
 0x33e   : > { %p602_p5 = pnand %p1059_p0, %p1058_p13 }
 0x340   : > { %761 = dma.done.wait (!%p602_p5), %s481_s10, 128  }
 0x341   : > { %763 = vsyncadd (!%p602_p5), %s481_s10, 4294967168  ;;  %p19_p10 = scmp.ge.s32.totalorder %s864_s29, 4   ;;  %s1060_s18 = smov %s770_s19 }
 0x342   : > { %s1061_s19 = smov %s774_s20  ;;  %s1062_s20 = smov %s900_s27 }
 0x343   : > { %s1063_s21 = smov %s864_s29  ;;  %21 = sbr.rel (!%p19_p10) target bundleno = 6 (0x6), region = 89 }
 0x34a   :  { %486 = vsyncpa [#allocation3], 1 }
 0x34b   :  { %488 = vsyncpa [#allocation3 + $0x1], 1 }
 0x34c   :  { %489 = vsyncpa [#allocation6], 1 }
 0x34d   :  { %490 = vsyncpa [#allocation4], 1 }
 0x34e   :  { %492 = vsyncpa [#allocation4 + $0x1], 1 }

</bundles_post_ra>
